<compile_context>
chip_gen: v6e
topology: v6e:2x2x1
jax: 0.10.0
libtpu: 0.0.40
codegen_flags: <defaults>
</compile_context>

<pallas_src>
import numpy as np
import jax
import jax.numpy as jnp
from jax.experimental import pallas as pl
from jax.experimental.pallas import tpu as pltpu


# ----------------------------------------------------------------------------
# Beta schedule + diffusion buffers (host-side, float64 like torch, cast to f32)
# ----------------------------------------------------------------------------
def _sigmoid(x):
    return 1.0 / (1.0 + np.exp(-x))


def sigmoid_beta_schedule_np(timesteps, start=-3, end=3, tau=1, clamp_min=1e-5):
    steps = timesteps + 1
    t = np.linspace(0, timesteps, steps, dtype=np.float64) / timesteps
    v_start = _sigmoid(start / tau)
    v_end = _sigmoid(end / tau)
    ac = (-_sigmoid((t * (end - start) + start) / tau) + v_end) / (v_end - v_start)
    ac = ac / ac[0]
    betas = 1.0 - ac[1:] / ac[:-1]
    return np.clip(betas, 0.0, 0.999)


def build_schedule(timesteps):
    betas = sigmoid_beta_schedule_np(timesteps)
    alphas = 1.0 - betas
    alphas_cumprod = np.cumprod(alphas, axis=0)
    snr = alphas_cumprod / (1.0 - alphas_cumprod)
    maybe_clipped_snr = snr.copy()           # min_snr_loss_weight=False
    loss_weight = maybe_clipped_snr / snr    # == 1 for objective='pred_noise'
    return {
        "num_timesteps": int(timesteps),
        "sqrt_alphas_cumprod": jnp.asarray(np.sqrt(alphas_cumprod), jnp.float32),
        "sqrt_one_minus_alphas_cumprod": jnp.asarray(
            np.sqrt(1.0 - alphas_cumprod), jnp.float32),
        "loss_weight": jnp.asarray(loss_weight, jnp.float32),
    }


# ----------------------------------------------------------------------------
# Synthetic model parameters (deterministic in-script init)
# ----------------------------------------------------------------------------
def init_model_params(channels, task_dim, key):
    kw, kv, kt, kb = jax.random.split(key, 4)
    return {
        # 1x1 conv over the 2*C concatenated channels -> C output channels
        "W": 0.1 * jax.random.normal(kw, (channels, 2 * channels), jnp.float32),
        "V": 0.1 * jax.random.normal(kv, (task_dim, channels), jnp.float32),
        "w_t": 0.1 * jax.random.normal(kt, (channels,), jnp.float32),
        "b": 0.01 * jax.random.normal(kb, (channels,), jnp.float32),
    }


# ----------------------------------------------------------------------------
# Pallas kernel: one batch-block per grid step
#   rows = Bblk*C on the sublane axis, HW on the lane axis
# ----------------------------------------------------------------------------
def _diffusion_loss_kernel(coef_ref, x_ref, cond_ref, noise_ref,
                           wbx_ref, wbc_ref, o_ref):
    # Per-row (row = batch*channel) scalar columns, broadcast along lanes.
    coefs = coef_ref[...]                       # (R, 4) f32
    a = coefs[:, 0:1]                           # 2 * sqrt(alphas_cumprod[t_b])
    c = coefs[:, 1:2]                           # sqrt(1 - alphas_cumprod[t_b])
    d = coefs[:, 2:3]                           # -sqrt(alphas_cumprod[t_b])
    bias = coefs[:, 3:4]                        # synthetic-model bias temb[b, ch]

    # Upcast bf16 streams to f32 immediately after load (portable to v5e).
    x = x_ref[...].astype(jnp.float32)          # (R, HW) image in [0, 1]
    cond = cond_ref[...].astype(jnp.float32)
    nz = noise_ref[...].astype(jnp.float32)

    # normalize_to_neg_one_to_one folded into q_sample:
    #   sqrt_ac*(2*img-1) + sqrt_1mac*noise == (2*sqrt_ac)*img + sqrt_1mac*noise - sqrt_ac
    x_t = a * x + c * nz + d

    # Synthetic denoiser: per-batch 1x1 conv over concat([x_t, cond], channel),
    # realised as one resident block-diagonal (R, R) matmul per stream so the
    # whole batch block goes through the MXU at once.
    out = (jnp.dot(wbx_ref[...], x_t, preferred_element_type=jnp.float32)
           + jnp.dot(wbc_ref[...], cond, preferred_element_type=jnp.float32)
           + bias)

    # objective='pred_noise' -> target = noise; loss_type='l1'.
    # Per-row mean over HW; per-batch mean over C and loss_weight applied in
    # the wrapper (B*C scalars, negligible).
    o_ref[...] = jnp.mean(jnp.abs(out - nz), axis=-1, keepdims=True)


def _choose_batch_block(B, C, HW, *, budget_bytes=24 << 20):
    """Largest batch block whose double-buffered bf16 streams fit the budget.

    rows = Bblk*C must be a multiple of 16 (bf16 sublane packing) unless the
    block covers the full batch (block dims == full dims is always legal).
    """
    candidates = [bb for bb in range(1, B + 1)
                  if B % bb == 0 and ((bb * C) % 16 == 0 or bb == B)]
    for bb in sorted(candidates, reverse=True):
        rows = bb * C
        need = 2 * 3 * rows * HW * 2 + 2 * rows * rows * 4   # streams + weights
        if need <= budget_bytes:
            return bb
    return min(candidates)


def goal_gaussian_diffusion_forward(img, img_cond, task_embed, key,
                                    schedule, params):
    """Returns the scalar training loss (matches GoalGaussianDiffusion.forward)."""
    B, C, H, W = img.shape
    HW = H * W
    R = B * C
    T = schedule["num_timesteps"]

    k_t, k_noise = jax.random.split(key)
    t = jax.random.randint(k_t, (B,), 0, T, dtype=jnp.int32)
    # bf16 noise stream halves the HBM read bytes of the kernel.
    # TODO(synk): generating noise in-kernel (pltpu.prng_seed + prng_random_bits)
    # would remove this stream entirely, but the RNG would no longer match
    # jax.random for the reference check, so it stays external here.
    noise = jax.random.normal(k_noise, (B, C, H, W),
                              jnp.float32).astype(jnp.bfloat16)

    # `extract(...)` gathers + coefficient folding (tiny glue over B scalars).
    sac = schedule["sqrt_alphas_cumprod"][t]                   # (B,)
    somac = schedule["sqrt_one_minus_alphas_cumprod"][t]       # (B,)
    lw = schedule["loss_weight"][t]                            # (B,)

    # per-batch bias of the synthetic model: model bias + time + task embedding
    t_norm = t.astype(jnp.float32) / float(T)
    temb = (task_embed @ params["V"]
            + t_norm[:, None] * params["w_t"][None, :]
            + params["b"][None, :])                            # (B, C)

    # One small (R, 4) coefficient tile: [2*sac, somac, -sac, bias] per row.
    per_b = jnp.stack([2.0 * sac, somac, -sac], axis=1)        # (B, 3)
    coefs = jnp.concatenate(
        [jnp.broadcast_to(per_b[:, None, :], (B, C, 3)), temb[:, :, None]],
        axis=-1).reshape(R, 4).astype(jnp.float32)             # (R, 4)

    # Block-diagonal 1x1-conv weights (resident across the whole grid): one
    # matmul mixes channels of every batch element in the block without
    # crossing batch boundaries.
    Bblk = _choose_batch_block(B, C, HW)
    Rblk = Bblk * C
    eye = jnp.eye(Bblk, dtype=jnp.float32)
    wbx = jnp.kron(eye, params["W"][:, :C])                    # (Rblk, Rblk)
    wbc = jnp.kron(eye, params["W"][:, C:])                    # (Rblk, Rblk)

    # batch*channel rows on the sublane axis, flattened spatial on the lane axis
    x = img.astype(jnp.bfloat16).reshape(R, HW)
    xc = img_cond.astype(jnp.bfloat16).reshape(R, HW)
    nz = noise.reshape(R, HW)

    n_blocks = B // Bblk
    vmem_est = (2 * (3 * Rblk * HW * 2 + Rblk * 4 * 4 + Rblk * 4)
                + 2 * 2 * Rblk * Rblk * 4)
    # Raise the scoped-VMEM default but stay well under v7x's 64 MiB physical.
    vmem_limit = int(min(max(4 * vmem_est, 16 << 20), 48 << 20))

    per_row = pl.pallas_call(
        _diffusion_loss_kernel,
        out_shape=jax.ShapeDtypeStruct((R, 1), jnp.float32),
        grid=(n_blocks,),
        in_specs=[
            pl.BlockSpec((Rblk, 4), lambda i: (i, 0)),         # coefs + bias
            pl.BlockSpec((Rblk, HW), lambda i: (i, 0)),        # img (bf16)
            pl.BlockSpec((Rblk, HW), lambda i: (i, 0)),        # img_cond (bf16)
            pl.BlockSpec((Rblk, HW), lambda i: (i, 0)),        # noise (bf16)
            pl.BlockSpec((Rblk, Rblk), lambda i: (0, 0)),      # W block-diag (x_t)
            pl.BlockSpec((Rblk, Rblk), lambda i: (0, 0)),      # W block-diag (cond)
        ],
        out_specs=pl.BlockSpec((Rblk, 1), lambda i: (i, 0)),   # disjoint per block
        compiler_params=pltpu.CompilerParams(
            dimension_semantics=("parallel",),                 # v7x: 2 TCs split batch
            vmem_limit_bytes=vmem_limit),
    )(coefs, x, xc, nz, wbx, wbc)

    per_batch = per_row.reshape(B, C).mean(axis=1)             # mean over C*H*W
    loss = jnp.mean(per_batch * lw)
    return loss, (t, noise)


# ----------------------------------------------------------------------------
# Pure-JAX reference (for a correctness sanity check)
# ----------------------------------------------------------------------------
def reference_loss(img, img_cond, task_embed, t, noise, schedule, params):
    x = img.astype(jnp.float32)
    xc = img_cond.astype(jnp.float32)
    nz = noise.astype(jnp.float32)
    B, C, H, W = x.shape
    T = schedule["num_timesteps"]
    sac = schedule["sqrt_alphas_cumprod"][t].reshape(B, 1, 1, 1)
    somac = schedule["sqrt_one_minus_alphas_cumprod"][t].reshape(B, 1, 1, 1)
    # normalize folded into q_sample (algebraically identical to the module's
    # sqrt_ac*(img*2-1) + sqrt_1mac*noise)
    x_t = (2.0 * sac) * x + somac * nz - sac
    xcat = jnp.concatenate([x_t, xc], axis=1)                  # (B, 2C, H, W)
    t_norm = t.astype(jnp.float32) / float(T)
    temb = (task_embed @ params["V"]
            + t_norm[:, None] * params["w_t"][None, :]
            + params["b"][None, :])
    out = jnp.einsum("oc,bchw->bohw", params["W"], xcat) + temb[:, :, None, None]
    per = jnp.mean(jnp.abs(out - nz).reshape(B, -1), axis=1)
    lw = schedule["loss_weight"][t]
    return jnp.mean(per * lw)


if __name__ == "__main__":
    B, C, H, W = 2, 4, 16, 16
    TASK_DIM = 32
    TIMESTEPS = 32

    root = jax.random.PRNGKey(0)
    k_img, k_cond, k_task, k_params, k_fwd = jax.random.split(root, 5)

    img = jax.random.uniform(k_img, (B, C, H, W),
                             jnp.float32).astype(jnp.bfloat16)      # in [0,1]
    img_cond = jax.random.uniform(k_cond, (B, C, H, W),
                                  jnp.float32).astype(jnp.bfloat16)
    task_embed = jax.random.normal(k_task, (B, TASK_DIM), jnp.float32)

    schedule = build_schedule(TIMESTEPS)
    params = init_model_params(C, TASK_DIM, k_params)

    loss, (t, noise) = goal_gaussian_diffusion_forward(
        img, img_cond, task_embed, k_fwd, schedule, params)
    loss = jax.block_until_ready(loss)

    ref = jax.block_until_ready(
        reference_loss(img, img_cond, task_embed, t, noise, schedule, params))

    assert np.isfinite(float(loss)), "non-finite loss"
    np.testing.assert_allclose(float(loss), float(ref), rtol=1e-3, atol=1e-4)
    print("KERNEL_OK")
</pallas_src>

<mosaic_0001>
module attributes {stable_mosaic.version = 11 : i64} {
  func.func @_diffusion_loss_kernel(%arg0: i32, %arg1: memref<8x4xf32, #tpu.memory_space<vmem>>, %arg2: memref<8x256xbf16, #tpu.memory_space<vmem>>, %arg3: memref<8x256xbf16, #tpu.memory_space<vmem>>, %arg4: memref<8x256xbf16, #tpu.memory_space<vmem>>, %arg5: memref<8x8xf32, #tpu.memory_space<vmem>>, %arg6: memref<8x8xf32, #tpu.memory_space<vmem>>, %arg7: memref<8x1xf32, #tpu.memory_space<vmem>>) attributes {dimension_semantics = [#tpu.dimension_semantics<parallel>], iteration_bounds = array<i64: 1>, scalar_prefetch = 0 : i64, scratch_operands = 0 : i64, tpu.core_type = #tpu.core_type<tc>, window_params = [{transform_indices = @transform_0, window_bounds = array<i64: 8, 4>}, {transform_indices = @transform_1, window_bounds = array<i64: 8, 256>}, {transform_indices = @transform_2, window_bounds = array<i64: 8, 256>}, {transform_indices = @transform_3, window_bounds = array<i64: 8, 256>}, {pipeline_mode = #tpu.pipeline_mode<synchronous>, transform_indices = @transform_4, window_bounds = array<i64: 8, 8>}, {pipeline_mode = #tpu.pipeline_mode<synchronous>, transform_indices = @transform_5, window_bounds = array<i64: 8, 8>}, {transform_indices = @transform_6, window_bounds = array<i64: 8, 1>}]} {
    %c0 = arith.constant 0 : index
    %c0_0 = arith.constant 0 : index
    %0 = vector.load %arg1[%c0, %c0_0] : memref<8x4xf32, #tpu.memory_space<vmem>>, vector<8x4xf32>
    %1 = vector.extract_strided_slice %0 {offsets = [0, 0], sizes = [8, 1], strides = [1, 1]} : vector<8x4xf32> to vector<8x1xf32>
    %2 = vector.extract_strided_slice %0 {offsets = [0, 1], sizes = [8, 1], strides = [1, 1]} : vector<8x4xf32> to vector<8x1xf32>
    %3 = vector.extract_strided_slice %0 {offsets = [0, 2], sizes = [8, 1], strides = [1, 1]} : vector<8x4xf32> to vector<8x1xf32>
    %4 = vector.extract_strided_slice %0 {offsets = [0, 3], sizes = [8, 1], strides = [1, 1]} : vector<8x4xf32> to vector<8x1xf32>
    %c0_1 = arith.constant 0 : index
    %c0_2 = arith.constant 0 : index
    %5 = vector.load %arg2[%c0_1, %c0_2] : memref<8x256xbf16, #tpu.memory_space<vmem>>, vector<8x256xbf16>
    %6 = arith.extf %5 : vector<8x256xbf16> to vector<8x256xf32>
    %c0_3 = arith.constant 0 : index
    %c0_4 = arith.constant 0 : index
    %7 = vector.load %arg3[%c0_3, %c0_4] : memref<8x256xbf16, #tpu.memory_space<vmem>>, vector<8x256xbf16>
    %8 = arith.extf %7 : vector<8x256xbf16> to vector<8x256xf32>
    %c0_5 = arith.constant 0 : index
    %c0_6 = arith.constant 0 : index
    %9 = vector.load %arg4[%c0_5, %c0_6] : memref<8x256xbf16, #tpu.memory_space<vmem>>, vector<8x256xbf16>
    %10 = arith.extf %9 : vector<8x256xbf16> to vector<8x256xf32>
    %11 = vector.broadcast %1 : vector<8x1xf32> to vector<8x256xf32>
    %12 = arith.mulf %11, %6 : vector<8x256xf32>
    %13 = vector.broadcast %2 : vector<8x1xf32> to vector<8x256xf32>
    %14 = arith.mulf %13, %10 : vector<8x256xf32>
    %15 = arith.addf %12, %14 : vector<8x256xf32>
    %16 = vector.broadcast %3 : vector<8x1xf32> to vector<8x256xf32>
    %17 = arith.addf %15, %16 : vector<8x256xf32>
    %c0_7 = arith.constant 0 : index
    %c0_8 = arith.constant 0 : index
    %18 = vector.load %arg5[%c0_7, %c0_8] : memref<8x8xf32, #tpu.memory_space<vmem>>, vector<8x8xf32>
    %cst = arith.constant dense<0.000000e+00> : vector<8x256xf32>
    %19 = tpu.matmul %18, %17, %cst {dimension_numbers = #tpu.dot_dimension_numbers<[1], [0], [0], [1], [0, 0, 1, 1], [], []>} : vector<8x8xf32>, vector<8x256xf32>, vector<8x256xf32> -> vector<8x256xf32>
    %c0_9 = arith.constant 0 : index
    %c0_10 = arith.constant 0 : index
    %20 = vector.load %arg6[%c0_9, %c0_10] : memref<8x8xf32, #tpu.memory_space<vmem>>, vector<8x8xf32>
    %cst_11 = arith.constant dense<0.000000e+00> : vector<8x256xf32>
    %21 = tpu.matmul %20, %8, %cst_11 {dimension_numbers = #tpu.dot_dimension_numbers<[1], [0], [0], [1], [0, 0, 1, 1], [], []>} : vector<8x8xf32>, vector<8x256xf32>, vector<8x256xf32> -> vector<8x256xf32>
    %22 = arith.addf %19, %21 : vector<8x256xf32>
    %23 = vector.broadcast %4 : vector<8x1xf32> to vector<8x256xf32>
    %24 = arith.addf %22, %23 : vector<8x256xf32>
    %25 = arith.subf %24, %10 : vector<8x256xf32>
    %26 = math.absf %25 : vector<8x256xf32>
    %cst_12 = arith.constant dense<0.000000e+00> : vector<8xf32>
    %27 = vector.multi_reduction <add>, %26, %cst_12 [1] : vector<8x256xf32> to vector<8xf32>
    %28 = vector.shape_cast %27 : vector<8xf32> to vector<8x1xf32>
    %cst_13 = arith.constant 2.560000e+02 : f32
    %29 = vector.broadcast %cst_13 : f32 to vector<8x1xf32>
    %30 = arith.divf %28, %29 : vector<8x1xf32>
    %c0_14 = arith.constant 0 : index
    %c0_15 = arith.constant 0 : index
    %31 = vector.load %arg7[%c0_14, %c0_15] : memref<8x1xf32, #tpu.memory_space<vmem>>, vector<8x1xf32>
    tpu.vector_store %arg7[%c0_14, %c0_15], %30 {strides = array<i32>} : memref<8x1xf32, #tpu.memory_space<vmem>>, vector<8x1xf32>,
    return
  }
  func.func @transform_0(%arg0: i32) -> (i32, i32) {
    %c0_i32 = arith.constant 0 : i32
    %c0_i32_0 = arith.constant 0 : i32
    return %arg0, %c0_i32 : i32, i32
  }
  func.func @transform_1(%arg0: i32) -> (i32, i32) {
    %c0_i32 = arith.constant 0 : i32
    %c0_i32_0 = arith.constant 0 : i32
    return %arg0, %c0_i32 : i32, i32
  }
  func.func @transform_2(%arg0: i32) -> (i32, i32) {
    %c0_i32 = arith.constant 0 : i32
    %c0_i32_0 = arith.constant 0 : i32
    return %arg0, %c0_i32 : i32, i32
  }
  func.func @transform_3(%arg0: i32) -> (i32, i32) {
    %c0_i32 = arith.constant 0 : i32
    %c0_i32_0 = arith.constant 0 : i32
    return %arg0, %c0_i32 : i32, i32
  }
  func.func @transform_4(%arg0: i32) -> (i32, i32) {
    %c0_i32 = arith.constant 0 : i32
    %c0_i32_0 = arith.constant 0 : i32
    %c0_i32_1 = arith.constant 0 : i32
    return %c0_i32, %c0_i32_0 : i32, i32
  }
  func.func @transform_5(%arg0: i32) -> (i32, i32) {
    %c0_i32 = arith.constant 0 : i32
    %c0_i32_0 = arith.constant 0 : i32
    %c0_i32_1 = arith.constant 0 : i32
    return %c0_i32, %c0_i32_0 : i32, i32
  }
  func.func @transform_6(%arg0: i32) -> (i32, i32) {
    %c0_i32 = arith.constant 0 : i32
    %c0_i32_0 = arith.constant 0 : i32
    return %arg0, %c0_i32 : i32, i32
  }
}

</mosaic_0001>

<bundles_post_ra>
// kernel: tpu_custom_call.1
= control target key start
LH: loop header
LB: loop body
LE: loop exit
PB: predicated region body
PF: predicated region fallthrough
CT: control target
= control target key end

     0   :  { %11 = vsyncpa [#allocation3], 0  ;;  %s408_s0 = inlined_call_operand.vmem [shape: f32[8,4], index: 0, kind: input, shape index: {}]   ;;  %s409_s1 = inlined_call_operand.vmem [shape: bf16[8,256], index: 1, kind: input, shape index: {}]   ;;  %s410_s2 = inlined_call_operand.hbm [shape: bf16[8,256], index: 2, kind: input, shape index: {}]   ;;  %s411_s3 = inlined_call_operand.vmem [shape: bf16[8,256], index: 3, kind: input, shape index: {}]   ;;  %s412_s4 = inlined_call_operand.hbm [shape: f32[8,8], index: 4, kind: input, shape index: {}]   ;;  %s413_s5 = inlined_call_operand.hbm [shape: f32[8,8], index: 5, kind: input, shape index: {}]   ;;  %s414_s6 = inlined_call_operand.vmem [shape: f32[8,1], index: 6, kind: output, shape index: {}]  }
   0x1   :  { %12 = vsyncpa [#allocation5], 0  ;;  %s342_s21 = smov [#allocation4]   ;;  %s343_s23 = smov [#allocation2]  }
   0x2   :  { %s35_s22 = sshll.u32 %s342_s21, 4  ;;  %s23_s24 = sshll.u32 %s343_s23, 4  ;;  %s36_s22 = int_to_ptr.vmem [resolvable:$true] %s35_s22  ;;  %s24_s24 = int_to_ptr.vmem [resolvable:$true] %s23_s24 }
   0x3   :  { %s286_s25 = scalar_lea.vmem %s36_s22, 128  ;;  %p291_p1 = scmp.lt.s32.totalorder %s36_s22, %s36_s22 }
   0x4   :  { %p287_p0 = scmp.ne.s32.totalorder %s36_s22, %s286_s25  ;;  %p292_p2 = scmp.lt.s32.totalorder %s286_s25, %s286_s25 }
   0x6   :  { %p293_p3 = por %p292_p2, %p291_p1 }
   0x8   :  { %p294_p4 = pnand %p293_p3, %p287_p0 }
   0xa   :  { %297 = shalt.err (!%p294_p4)
}
   0xb   :  { %38 = dma.hbm_to_vmem [thread:$0]  %s412_s4, 128, %s36_s22, [#allocation5]  }
   0xc   :  { %s306_s28 = scalar_lea.vmem %s24_s24, 128  ;;  %p311_p6 = scmp.lt.s32.totalorder %s24_s24, %s24_s24 }
   0xd   :  { %p307_p5 = scmp.ne.s32.totalorder %s24_s24, %s306_s28  ;;  %p312_p7 = scmp.lt.s32.totalorder %s306_s28, %s306_s28 }
   0xf   :  { %p313_p8 = por %p312_p7, %p311_p6 }
  0x11   :  { %p314_p9 = pnand %p313_p8, %p307_p5 }
  0x13   :  { %317 = shalt.err (!%p314_p9)
}
  0x14   :  { %26 = dma.hbm_to_vmem [thread:$0]  %s410_s2, 128, %s24_s24, [#allocation3]  }
  0x15   :  { %s344_s7 = smov [#allocation6]  }
  0x16   :  { %s45_s8 = sshll.u32 %s344_s7, 4  ;;  %s46_s8 = int_to_ptr.vmem [resolvable:$true] %s45_s8 }
  0x17   :  { %s326_s9 = scalar_lea.vmem %s46_s8, 128  ;;  %p331_p11 = scmp.lt.s32.totalorder %s46_s8, %s46_s8 }
  0x18   :  { %p327_p10 = scmp.ne.s32.totalorder %s46_s8, %s326_s9  ;;  %p332_p12 = scmp.lt.s32.totalorder %s326_s9, %s326_s9 }
  0x1a   :  { %p333_p13 = por %p332_p12, %p331_p11 }
  0x1c   :  { %p334_p0 = pnand %p333_p13, %p327_p10 }
  0x1e   :  { %337 = shalt.err (!%p334_p0)
}
  0x1f   :  { %48 = dma.hbm_to_vmem [thread:$0]  %s413_s5, 128, %s46_s8, [#allocation5]  }
  0x20   :  { %338 = dma.done.wait [#allocation3], 128  }
  0x21   :  { %339 = vsyncadd [#allocation3], 4294967168 }
  0x22   :  { %340 = dma.done.wait [#allocation5], 256  }
  0x23   :  { %341 = vsyncadd [#allocation5], 4294967040  ;;  %v345_v0 = vmov 0   ;;  %v346_v1 = vmov 2   ;;  %v58_v2 = vld [vmem:[%s408_s0] sm:$0xff]  ;;  %v347_v6 = vmov 1  }
  0x24   :  { %273 = vset.pattern.permute.xlu0 %v345_v0  ;;  %275 = vset.pattern.permute.xlu1 %v346_v1  ;;  %v62_v3 = vld [vmem:[#allocation2] sm:$0xff]  ;;  %v348_v7 = vmov 0.0   ;;  %v90_v8 = vld [vmem:[#allocation6] sm:$0xff]  ;;  %vm91_vm0 = vcmask 64512   ;;  %v349_v9 = vmov 3   ;;  %v89_v27 = vld [vmem:[#allocation4] sm:$0xff] }
  0x25   :  { %70 = vperm.xlu0 %273, %v58_v2   ;;  %84 = vperm.xlu1 %275, %v58_v2   ;;  %v64_v4 = vunpack.c.h.bf16 %v62_v3  ;;  %v63_v5 = vunpack.c.l.bf16 %v62_v3  ;;  %v59_v10 = vld [vmem:[%s409_s1] sm:$0xff]  ;;  %vm255_vm1 = vcmask 7168  }
  0x26   :  { %159 = vmatprep.mubr.f32.mxu0 %v348_v7  ;;  %233 = vmatprep.mubr.f32.mxu1 %v348_v7  ;;  %v65_v11 = vld [vmem:[%s411_s3] sm:$0xff]  ;;  %v60_v13 = vunpack.c.l.bf16 %v59_v10  ;;  %v61_v14 = vunpack.c.h.bf16 %v59_v10 }
  0x27   :  { %125 = vmatprep.subr.mxu0 %v64_v4  ;;  %v66_v15 = vunpack.c.l.bf16 %v65_v11  ;;  %v67_v16 = vunpack.c.h.bf16 %v65_v11 }
  0x28   :  { %126 = vmatpush1.msra.mxu0 %v63_v5 }
  0x29   :  { %274 = vset.pattern.permute.xlu0 %v347_v6  ;;  %263 = vmatmul.mubr.msk.f32.vlgmr.msra.gmra.mxu0 %vm91_vm0, %v90_v8 }
  0x2a   :  { %76 = vperm.xlu0 %274, %v58_v2   ;;  %276 = vset.pattern.permute.xlu1 %v349_v9 }
  0x2b   :  { %241 = vperm.xlu1 %276, %v58_v2  }
  0x2e   :  { %277 = vset.pattern.permute.xlu0 %v349_v9 }
  0xa0   :  { %v71_v12 = vpop.permute.xlu0 %70  ;;  %v85_v22 = vpop.permute.xlu1 %84 }
  0xa1   :  { %v73_v18 = vmul.f32 %v71_v12, %v60_v13  ;;  %v74_v19 = vmul.f32 %v71_v12, %v61_v14 }
  0xa5   :  { %v77_v17 = vpop.permute.xlu0 %76 }
  0xa6   :  { %v79_v20 = vmul.f32 %v77_v17, %v66_v15  ;;  %v80_v21 = vmul.f32 %v77_v17, %v67_v16  ;;  %v242_v30 = vpop.permute.xlu1 %241 }
  0xa8   :  { %v81_v23 = vadd.f32 %v79_v20, %v73_v18  ;;  %v82_v24 = vadd.f32 %v80_v21, %v74_v19 }
  0xaa   :  { %v88_v25 = vadd.f32 %v85_v22, %v82_v24  ;;  %v87_v26 = vadd.f32 %v85_v22, %v81_v23 }
  0xac   :  { %199 = vmatprep.subr.mxu1 %v88_v25 }
  0xad   :  { %200 = vmatpush1.msra.mxu1 %v87_v26 }
  0xae   :  { %264 = vmatmul.mubr.msk.f32.vlgmr.msra.gmra.mxu1 %vm91_vm0, %v89_v27 }
  0xe9   :  { %v161_v28 = vpop.f32.mrf.mxu0 }
  0xeb   :  { %v163_v32 = vpop.f32.mrf.mxu0 }
 0x16e   :  { %v235_v29 = vpop.f32.mrf.mxu1 }
 0x16f   :  { %v236_v31 = vadd.f32 %v235_v29, %v161_v28 }
 0x170   :  { %v237_v33 = vpop.f32.mrf.mxu1 }
 0x171   :  { %v244_v34 = vadd.f32 %v242_v30, %v236_v31  ;;  %v238_v35 = vadd.f32 %v237_v33, %v163_v32 }
 0x173   :  { %v246_v36 = vsub.f32 %v244_v34, %v66_v15  ;;  %v245_v37 = vadd.f32 %v242_v30, %v238_v35 }
 0x175   :  { %v247_v38 = vsub.f32 %v245_v37, %v67_v16  ;;  %v248_v39 = vand.u32 2147483647, %v246_v36 }
 0x177   :  { %v249_v40 = vand.u32 2147483647, %v247_v38 }
 0x179   :  { %v250_v41 = vadd.f32 %v249_v40, %v248_v39 }
 0x17b   :  { %251 = vadd.xlane.f32.xlu1 %v250_v41 }
 0x204   :  { %v252_v42 = vpop.xlane.xlu1 %251 }
 0x205   :  { %v254_v43 = vmul.f32 0.00390625, %v252_v42 }
 0x207   :  { %256 = vst.msk [vmem:[%s414_s6] sm:$0xff] %vm255_vm1, %v254_v43 }
 0x208   :  { %261 = vsyncpa [#allocation3], 1 }
 0x209   :  { %262 = vsyncpa [#allocation5], 1 }

</bundles_post_ra>
